<compile_context>
chip_gen: v5e
topology: v5e:2x2
jax: 0.10.0
libtpu: 0.0.40
codegen_flags: <defaults>
</compile_context>

<pallas_src>
import jax
import jax.numpy as jnp
from jax.experimental import pallas as pl
from jax.experimental.pallas import tpu as pltpu

H = W = 8                  # input spatial size
CH, CW = H - 2, W - 2      # conv output (6, 6)
PH, PW = CH // 2, CW // 2  # pooled output (3, 3) -> 9 flat features


def net_kernel(scal_ref, slab_ref, out_ref):
    # scal_ref : SMEM f32[16]  = [cw00..cw22 (9), conv bias (1), pad...]
    # slab_ref : VMEM f32[16,128]
    #   [0:8, 0:8]    x plane
    #   [8:13, 0:15]  fc1 weights, pool-selection folded in: [W0 | W1 | W2], each (5,5)
    #   [13, 0:5]     b1
    #   [13, 8:10]    b2
    #   [14:16, 0:5]  w2 (2,5)
    x = slab_ref[0:8, 0:8]                                   # (8, 8)

    # --- conv1: 3x3 valid cross-correlation = 9 scalar-weighted shifted views (VPU) ---
    terms = [x[a:a + CH, b:b + CW] * scal_ref[3 * a + b]
             for a in range(3) for b in range(3)]
    acc = (((terms[0] + terms[1]) + (terms[2] + terms[3]))
           + ((terms[4] + terms[5]) + (terms[6] + terms[7]))) + terms[8]
    y = jnp.maximum(acc + scal_ref[9], 0.0)                  # relu -> (6, 6)

    # --- 2x2 / stride-2 max pool on the VPU via shifted-view maxima ---
    # pooled[i, k] ends up at rmax[2i, 2k]; odd rows/cols of rmax are ignored
    # (their contributions are zeroed in the padded fc1 weights below).
    cmax = jnp.maximum(y[:, 0:CW - 1], y[:, 1:CW])           # (6, 5)
    rmax = jnp.maximum(cmax[0:CH - 1, :], cmax[1:CH, :])     # (5, 5)

    # --- fc1: three independent (1,5)@(5,5) MXU dots, summed once, then relu ---
    w1w = slab_ref[8:13, 0:15]                               # (5, 15)
    b1 = slab_ref[13:14, 0:5]                                # (1, 5)
    p0 = jnp.dot(rmax[0:1, :], w1w[:, 0:5], preferred_element_type=jnp.float32)
    p1 = jnp.dot(rmax[2:3, :], w1w[:, 5:10], preferred_element_type=jnp.float32)
    p2 = jnp.dot(rmax[4:5, :], w1w[:, 10:15], preferred_element_type=jnp.float32)
    h = jnp.maximum((p0 + p1) + (p2 + b1), 0.0)              # (1, 5)

    # --- fc2 on the VPU: two broadcast-mul + lane-reduce dot products ---
    w2 = slab_ref[14:16, 0:5]                                # (2, 5)
    b2 = slab_ref[13:14, 8:10]                               # (1, 2)
    o0 = jnp.sum(h * w2[0:1, :], axis=1, keepdims=True)      # (1, 1)
    o1 = jnp.sum(h * w2[1:2, :], axis=1, keepdims=True)      # (1, 1)
    out_ref[...] = jnp.concatenate([o0, o1], axis=1) + b2    # (1, 2)


def net_forward(x, params):
    """x: (1, 1, 8, 8) f32 NCHW.  Returns (1, 2) f32."""
    cw, cb, w1, b1, w2, b2 = params
    assert x.shape == (1, 1, H, W)

    # Packed SMEM scalar vector: 9 conv weights + conv bias, padded to 16 floats
    # (1-D SMEM pads to only 64 bytes vs ~4 KiB for a 2-D SMEM ref).
    scal = jnp.zeros((16,), jnp.float32)
    scal = scal.at[0:9].set(cw.reshape(9).astype(jnp.float32))
    scal = scal.at[9:10].set(cb.astype(jnp.float32))

    # fc1 weight with the maxpool selection folded in:
    #   W_i[c, j] = w1[j, 3*i + c//2] for even c, 0 for odd c   (i = pooled row)
    w1r = jnp.transpose(w1.reshape(5, 3, 3).astype(jnp.float32), (1, 2, 0))  # [i, k, j]
    w1pad = jnp.zeros((3, 5, 5), jnp.float32).at[:, 0::2, :].set(w1r)        # [i, c, j]
    w1wide = jnp.concatenate([w1pad[0], w1pad[1], w1pad[2]], axis=1)         # (5, 15)

    # Single padded VMEM slab (16, 128) f32 holding x and all fc parameters.
    slab = jnp.zeros((16, 128), jnp.float32)
    slab = slab.at[0:8, 0:8].set(x[0, 0].astype(jnp.float32))
    slab = slab.at[8:13, 0:15].set(w1wide)
    slab = slab.at[13, 0:5].set(b1.astype(jnp.float32))
    slab = slab.at[13, 8:10].set(b2.astype(jnp.float32))
    slab = slab.at[14:16, 0:5].set(w2.astype(jnp.float32))

    return pl.pallas_call(
        net_kernel,
        out_shape=jax.ShapeDtypeStruct((1, 2), jnp.float32),
        in_specs=[pl.BlockSpec(memory_space=pltpu.MemorySpace.SMEM),
                  pl.BlockSpec(memory_space=pltpu.MemorySpace.VMEM)],
        out_specs=pl.BlockSpec(memory_space=pltpu.MemorySpace.VMEM),
    )(scal, slab)


def net_reference(x, params):
    """Pure-JAX reference of the PyTorch forward (batch=1)."""
    cw, cb, w1, b1, w2, b2 = params
    x2d = x[0, 0]
    acc = jnp.zeros((CH, CW), jnp.float32)
    for a in range(3):
        for b in range(3):
            acc = acc + x2d[a:a + CH, b:b + CW] * cw[0, 0, a, b]
    y = jnp.maximum(acc + cb[0], 0.0)
    pooled = jnp.max(y.reshape(PH, 2, PW, 2), axis=(1, 3))
    feat = pooled.reshape(1, PH * PW)
    h = jnp.maximum(feat @ w1.T + b1, 0.0)
    return h @ w2.T + b2


if __name__ == "__main__":
    key = jax.random.PRNGKey(0)
    ks = jax.random.split(key, 7)
    x = jax.random.normal(ks[0], (1, 1, H, W), jnp.float32)
    # Deterministic synthetic parameters (shapes from the module's __init__).
    cw = jax.random.normal(ks[1], (1, 1, 3, 3), jnp.float32) * 0.3   # conv1.weight
    cb = jax.random.normal(ks[2], (1,), jnp.float32) * 0.1           # conv1.bias
    w1 = jax.random.normal(ks[3], (5, 9), jnp.float32) * 0.3         # fc1.weight
    b1 = jax.random.normal(ks[4], (5,), jnp.float32) * 0.1           # fc1.bias
    w2 = jax.random.normal(ks[5], (2, 5), jnp.float32) * 0.3         # fc2.weight
    b2 = jax.random.normal(ks[6], (2,), jnp.float32) * 0.1           # fc2.bias
    params = (cw, cb, w1, b1, w2, b2)

    out = jax.jit(net_forward)(x, params)
    jax.block_until_ready(out)

    ref = net_reference(x, params)
    assert out.shape == (1, 2)
    assert jnp.allclose(out, ref, atol=1e-4), (out, ref)
    print("KERNEL_OK")
</pallas_src>

<mosaic_0001>
module attributes {stable_mosaic.version = 11 : i64} {
  func.func @net_kernel(%arg0: memref<16xf32, #tpu.memory_space<smem>>, %arg1: memref<16x128xf32, #tpu.memory_space<vmem>>, %arg2: memref<1x2xf32, #tpu.memory_space<vmem>>) attributes {dimension_semantics = [], scalar_prefetch = 0 : i64, scratch_operands = 0 : i64, tpu.core_type = #tpu.core_type<tc>} {
    %c0 = arith.constant 0 : index
    %c0_0 = arith.constant 0 : index
    %0 = vector.load %arg1[%c0, %c0_0] : memref<16x128xf32, #tpu.memory_space<vmem>>, vector<8x8xf32>
    %1 = vector.extract_strided_slice %0 {offsets = [0, 0], sizes = [6, 6], strides = [1, 1]} : vector<8x8xf32> to vector<6x6xf32>
    %c0_1 = arith.constant 0 : index
    %2 = memref.load %arg0[%c0_1] : memref<16xf32, #tpu.memory_space<smem>>
    %3 = vector.broadcast %2 : f32 to vector<6x6xf32>
    %4 = arith.mulf %1, %3 : vector<6x6xf32>
    %5 = vector.extract_strided_slice %0 {offsets = [0, 1], sizes = [6, 6], strides = [1, 1]} : vector<8x8xf32> to vector<6x6xf32>
    %c1 = arith.constant 1 : index
    %6 = memref.load %arg0[%c1] : memref<16xf32, #tpu.memory_space<smem>>
    %7 = vector.broadcast %6 : f32 to vector<6x6xf32>
    %8 = arith.mulf %5, %7 : vector<6x6xf32>
    %9 = vector.extract_strided_slice %0 {offsets = [0, 2], sizes = [6, 6], strides = [1, 1]} : vector<8x8xf32> to vector<6x6xf32>
    %c2 = arith.constant 2 : index
    %10 = memref.load %arg0[%c2] : memref<16xf32, #tpu.memory_space<smem>>
    %11 = vector.broadcast %10 : f32 to vector<6x6xf32>
    %12 = arith.mulf %9, %11 : vector<6x6xf32>
    %13 = vector.extract_strided_slice %0 {offsets = [1, 0], sizes = [6, 6], strides = [1, 1]} : vector<8x8xf32> to vector<6x6xf32>
    %c3 = arith.constant 3 : index
    %14 = memref.load %arg0[%c3] : memref<16xf32, #tpu.memory_space<smem>>
    %15 = vector.broadcast %14 : f32 to vector<6x6xf32>
    %16 = arith.mulf %13, %15 : vector<6x6xf32>
    %17 = vector.extract_strided_slice %0 {offsets = [1, 1], sizes = [6, 6], strides = [1, 1]} : vector<8x8xf32> to vector<6x6xf32>
    %c4 = arith.constant 4 : index
    %18 = memref.load %arg0[%c4] : memref<16xf32, #tpu.memory_space<smem>>
    %19 = vector.broadcast %18 : f32 to vector<6x6xf32>
    %20 = arith.mulf %17, %19 : vector<6x6xf32>
    %21 = vector.extract_strided_slice %0 {offsets = [1, 2], sizes = [6, 6], strides = [1, 1]} : vector<8x8xf32> to vector<6x6xf32>
    %c5 = arith.constant 5 : index
    %22 = memref.load %arg0[%c5] : memref<16xf32, #tpu.memory_space<smem>>
    %23 = vector.broadcast %22 : f32 to vector<6x6xf32>
    %24 = arith.mulf %21, %23 : vector<6x6xf32>
    %25 = vector.extract_strided_slice %0 {offsets = [2, 0], sizes = [6, 6], strides = [1, 1]} : vector<8x8xf32> to vector<6x6xf32>
    %c6 = arith.constant 6 : index
    %26 = memref.load %arg0[%c6] : memref<16xf32, #tpu.memory_space<smem>>
    %27 = vector.broadcast %26 : f32 to vector<6x6xf32>
    %28 = arith.mulf %25, %27 : vector<6x6xf32>
    %29 = vector.extract_strided_slice %0 {offsets = [2, 1], sizes = [6, 6], strides = [1, 1]} : vector<8x8xf32> to vector<6x6xf32>
    %c7 = arith.constant 7 : index
    %30 = memref.load %arg0[%c7] : memref<16xf32, #tpu.memory_space<smem>>
    %31 = vector.broadcast %30 : f32 to vector<6x6xf32>
    %32 = arith.mulf %29, %31 : vector<6x6xf32>
    %33 = vector.extract_strided_slice %0 {offsets = [2, 2], sizes = [6, 6], strides = [1, 1]} : vector<8x8xf32> to vector<6x6xf32>
    %c8 = arith.constant 8 : index
    %34 = memref.load %arg0[%c8] : memref<16xf32, #tpu.memory_space<smem>>
    %35 = vector.broadcast %34 : f32 to vector<6x6xf32>
    %36 = arith.mulf %33, %35 : vector<6x6xf32>
    %37 = arith.addf %4, %8 : vector<6x6xf32>
    %38 = arith.addf %12, %16 : vector<6x6xf32>
    %39 = arith.addf %37, %38 : vector<6x6xf32>
    %40 = arith.addf %20, %24 : vector<6x6xf32>
    %41 = arith.addf %28, %32 : vector<6x6xf32>
    %42 = arith.addf %40, %41 : vector<6x6xf32>
    %43 = arith.addf %39, %42 : vector<6x6xf32>
    %44 = arith.addf %43, %36 : vector<6x6xf32>
    %c9 = arith.constant 9 : index
    %45 = memref.load %arg0[%c9] : memref<16xf32, #tpu.memory_space<smem>>
    %46 = vector.broadcast %45 : f32 to vector<6x6xf32>
    %47 = arith.addf %44, %46 : vector<6x6xf32>
    %cst = arith.constant 0.000000e+00 : f32
    %48 = vector.broadcast %cst : f32 to vector<6x6xf32>
    %49 = arith.maximumf %47, %48 : vector<6x6xf32>
    %50 = vector.extract_strided_slice %49 {offsets = [0, 0], sizes = [6, 5], strides = [1, 1]} : vector<6x6xf32> to vector<6x5xf32>
    %51 = vector.extract_strided_slice %49 {offsets = [0, 1], sizes = [6, 5], strides = [1, 1]} : vector<6x6xf32> to vector<6x5xf32>
    %52 = arith.maximumf %50, %51 : vector<6x5xf32>
    %53 = vector.extract_strided_slice %52 {offsets = [0, 0], sizes = [5, 5], strides = [1, 1]} : vector<6x5xf32> to vector<5x5xf32>
    %54 = vector.extract_strided_slice %52 {offsets = [1, 0], sizes = [5, 5], strides = [1, 1]} : vector<6x5xf32> to vector<5x5xf32>
    %55 = arith.maximumf %53, %54 : vector<5x5xf32>
    %c8_2 = arith.constant 8 : index
    %c0_3 = arith.constant 0 : index
    %56 = vector.load %arg1[%c8_2, %c0_3] : memref<16x128xf32, #tpu.memory_space<vmem>>, vector<5x15xf32>
    %c13 = arith.constant 13 : index
    %c0_4 = arith.constant 0 : index
    %57 = vector.load %arg1[%c13, %c0_4] : memref<16x128xf32, #tpu.memory_space<vmem>>, vector<1x5xf32>
    %58 = vector.extract_strided_slice %55 {offsets = [0, 0], sizes = [1, 5], strides = [1, 1]} : vector<5x5xf32> to vector<1x5xf32>
    %59 = vector.extract_strided_slice %56 {offsets = [0, 0], sizes = [5, 5], strides = [1, 1]} : vector<5x15xf32> to vector<5x5xf32>
    %cst_5 = arith.constant dense<0.000000e+00> : vector<1x5xf32>
    %60 = tpu.matmul %58, %59, %cst_5 {dimension_numbers = #tpu.dot_dimension_numbers<[1], [0], [0], [1], [0, 0, 1, 1], [], []>} : vector<1x5xf32>, vector<5x5xf32>, vector<1x5xf32> -> vector<1x5xf32>
    %61 = vector.extract_strided_slice %55 {offsets = [2, 0], sizes = [1, 5], strides = [1, 1]} : vector<5x5xf32> to vector<1x5xf32>
    %62 = vector.extract_strided_slice %56 {offsets = [0, 5], sizes = [5, 5], strides = [1, 1]} : vector<5x15xf32> to vector<5x5xf32>
    %cst_6 = arith.constant dense<0.000000e+00> : vector<1x5xf32>
    %63 = tpu.matmul %61, %62, %cst_6 {dimension_numbers = #tpu.dot_dimension_numbers<[1], [0], [0], [1], [0, 0, 1, 1], [], []>} : vector<1x5xf32>, vector<5x5xf32>, vector<1x5xf32> -> vector<1x5xf32>
    %64 = vector.extract_strided_slice %55 {offsets = [4, 0], sizes = [1, 5], strides = [1, 1]} : vector<5x5xf32> to vector<1x5xf32>
    %65 = vector.extract_strided_slice %56 {offsets = [0, 10], sizes = [5, 5], strides = [1, 1]} : vector<5x15xf32> to vector<5x5xf32>
    %cst_7 = arith.constant dense<0.000000e+00> : vector<1x5xf32>
    %66 = tpu.matmul %64, %65, %cst_7 {dimension_numbers = #tpu.dot_dimension_numbers<[1], [0], [0], [1], [0, 0, 1, 1], [], []>} : vector<1x5xf32>, vector<5x5xf32>, vector<1x5xf32> -> vector<1x5xf32>
    %67 = arith.addf %60, %63 : vector<1x5xf32>
    %68 = arith.addf %66, %57 : vector<1x5xf32>
    %69 = arith.addf %67, %68 : vector<1x5xf32>
    %cst_8 = arith.constant 0.000000e+00 : f32
    %70 = vector.broadcast %cst_8 : f32 to vector<1x5xf32>
    %71 = arith.maximumf %69, %70 : vector<1x5xf32>
    %c14 = arith.constant 14 : index
    %c0_9 = arith.constant 0 : index
    %72 = vector.load %arg1[%c14, %c0_9] : memref<16x128xf32, #tpu.memory_space<vmem>>, vector<2x5xf32>
    %c13_10 = arith.constant 13 : index
    %c8_11 = arith.constant 8 : index
    %73 = vector.load %arg1[%c13_10, %c8_11] : memref<16x128xf32, #tpu.memory_space<vmem>>, vector<1x2xf32>
    %74 = vector.extract_strided_slice %72 {offsets = [0, 0], sizes = [1, 5], strides = [1, 1]} : vector<2x5xf32> to vector<1x5xf32>
    %75 = arith.mulf %71, %74 : vector<1x5xf32>
    %cst_12 = arith.constant dense<0.000000e+00> : vector<1xf32>
    %76 = vector.multi_reduction <add>, %75, %cst_12 [1] : vector<1x5xf32> to vector<1xf32>
    %77 = vector.shape_cast %76 : vector<1xf32> to vector<1x1xf32>
    %78 = vector.extract_strided_slice %72 {offsets = [1, 0], sizes = [1, 5], strides = [1, 1]} : vector<2x5xf32> to vector<1x5xf32>
    %79 = arith.mulf %71, %78 : vector<1x5xf32>
    %cst_13 = arith.constant dense<0.000000e+00> : vector<1xf32>
    %80 = vector.multi_reduction <add>, %79, %cst_13 [1] : vector<1x5xf32> to vector<1xf32>
    %81 = vector.shape_cast %80 : vector<1xf32> to vector<1x1xf32>
    %82 = tpu.concatenate %77, %81 in 1 : vector<1x1xf32>, vector<1x1xf32> -> vector<1x2xf32>
    %83 = arith.addf %82, %73 : vector<1x2xf32>
    %c0_14 = arith.constant 0 : index
    %c0_15 = arith.constant 0 : index
    %84 = vector.load %arg2[%c0_14, %c0_15] : memref<1x2xf32, #tpu.memory_space<vmem>>, vector<1x2xf32>
    tpu.vector_store %arg2[%c0_14, %c0_15], %83 {strides = array<i32>} : memref<1x2xf32, #tpu.memory_space<vmem>>, vector<1x2xf32>,
    return
  }
}

</mosaic_0001>

<bundles_post_ra>
// kernel: net_forward.1
= control target key start
LH: loop header
LB: loop body
LE: loop exit
PB: predicated region body
PF: predicated region fallthrough
CT: control target
= control target key end

     0   :  { %7 = vsyncpa [#allocation4], 0  ;;  %s346_s0 = inlined_call_operand.vmem [shape: f32[16], index: 0, kind: input, shape index: {}]   ;;  %s347_s1 = inlined_call_operand.vmem [shape: f32[16,128], index: 1, kind: input, shape index: {}]   ;;  %s348_s2 = inlined_call_operand.hbm [shape: f32[1,2], index: 2, kind: output, shape index: {}]  }
   0x1   :  { %8 = vsyncpa [#allocation3], 0  ;;  %s14_s11 = sshll.u32 %s346_s0, 4  ;;  %s299_s12 = smov [#allocation2]   ;;  %s15_s11 = int_to_ptr.vmem [resolvable:$true] %s14_s11 }
   0x2   :  { %17 = dma.vmem_to_smem %s15_s11, 16, %s299_s12, [#allocation4]  }
   0x3   :  { %295 = dma.done.wait [#allocation4], 16  }
   0x4   :  { %296 = vsyncadd [#allocation4], 4294967280 }
   0x5   :  { %24 = sfence }
   0x6   :  { %s241_s13 = sld [smem:[#allocation2 + $0x7]]  ;;  %v25_v0 = vld [vmem:[%s347_s1] sm:$0xff]  ;;  %s300_s17 = smov 127   ;;  %v110_v22 = vld [vmem:[%s347_s1 + $0x8] sm:$0x1f]  ;;  %vm120_vm0 = vcmask 1044480  }
   0x7   :  { %s237_s14 = sld [smem:[#allocation2 + $0x3]]  ;;  %s301_s0 = smov 2   ;;  %246 = vmatpush.msk.msra.mxu1 %vm120_vm0, %v110_v22  ;;  %vm117_vm1 = vcmask 39936   ;;  %v111_v51 = vld [vmem:[%s347_s1 + $0xd] sm:$0x1]  ;;  %vm198_vm2 = vcmask 32768  }
   0x8   :  { %s239_s18 = sld [smem:[#allocation2 + $0x5]]  ;;  %s302_s22 = smov 1   ;;  %v196_v55 = vld [vmem:[%s347_s1 + $0xe] sm:$0x3]  ;;  %vm209_vm3 = vcmask 7168   ;;  %vm216_vm4 = vcmask 8192  }
   0x9   :  { %s235_s19 = sld [smem:[#allocation2 + $0x1]]  ;;  %s303_s23 = smov 126   ;;  %v203_v59 = vrot.slane %v196_v55, 1 }
   0xa   :  { %s240_s20 = sld [smem:[#allocation2 + $0x6]]  ;;  %s304_s28 = smov 123  }
   0xb   :  { %s236_s21 = sld [smem:[#allocation2 + $0x2]]  ;;  %s305_s29 = smov 118  }
   0xc   :  { %v48_v1 = vstv %s241_s13  ;;  %s242_s24 = sld [smem:[#allocation2 + $0x8]]  ;;  %s306_s6 = smov 120  }
   0xd   :  { %v49_v2 = vmul.f32 %v48_v1, %v25_v0  ;;  %v36_v3 = vstv %s237_s14  ;;  %s238_s27 = sld [smem:[#allocation2 + $0x4]]  ;;  %s307_s9 = smov [#allocation5]  }
   0xe   :  { %v37_v4 = vmul.f32 %v36_v3, %v25_v0  ;;  %v42_v6 = vstv %s239_s18  ;;  %s26_s30 = sld [smem:[#allocation2]]  ;;  %s223_s10 = sshll.u32 %s307_s9, 4  ;;  %s224_s10 = int_to_ptr.vmem [resolvable:$true] %s223_s10 }
   0xf   :  { %75 = vrot.lane.b32.xlu0 %v49_v2, %s300_s17  ;;  %v43_v7 = vmul.f32 %v42_v6, %v25_v0  ;;  %v30_v8 = vstv %s235_s19  ;;  %s243_s3 = sld [smem:[#allocation2 + $0x9]]  ;;  %s225_s1 = sshll.u32 %s348_s2, 4  ;;  %s226_s1 = int_to_ptr.hbm [resolvable:$true] %s225_s1 }
  0x10   :  { %v59_v5 = vrot.slane %v37_v4, 1  ;;  %v31_v9 = vmul.f32 %v30_v8, %v25_v0  ;;  %v45_v10 = vstv %s240_s20 }
  0x11   :  { %v46_v11 = vmul.f32 %v45_v10, %v25_v0  ;;  %v33_v12 = vstv %s236_s21 }
  0x12   :  { %60 = vrot.lane.b32.xlu1 %v59_v5, %s301_s0  ;;  %54 = vrot.lane.b32.xlu2 %v31_v9, %s300_s17  ;;  %v34_v14 = vmul.f32 %v33_v12, %v25_v0  ;;  %v51_v19 = vstv %s242_s24 }
  0x13   :  { %v52_v20 = vmul.f32 %v51_v19, %v25_v0  ;;  %v39_v23 = vstv %s238_s27 }
  0x14   :  { %v40_v24 = vmul.f32 %v39_v23, %v25_v0  ;;  %v27_v31 = vstv %s26_s30 }
  0x15   :  { %v92_v21 = vrot.slane %v52_v20, 2  ;;  %v28_v32 = vmul.f32 %v27_v31, %v25_v0  ;;  %v98_v39 = vstv %s243_s3 }
  0x17   :  { %70 = vrot.lane.b32.xlu0 %v43_v7, %s300_s17 }
  0x6c   :  { %v55_v30 = vpop.permute.xlu2 %54 }
  0x6d   :  { %v57_v33 = vadd.f32 %v55_v30, %v28_v32 }
  0x81   :  { %v76_v13 = vpop.permute.xlu0 %75 }
  0x82   :  { %v78_v15 = vadd.f32 %v76_v13, %v46_v11 }
  0x84   :  { %v80_v16 = vrot.slane %v78_v15, 1  ;;  %v61_v17 = vpop.permute.xlu1 %60 }
  0x85   :  { %v63_v18 = vadd.f32 %v61_v17, %v34_v14 }
  0x86   :  { %81 = vrot.lane.b32.xlu1 %v80_v16, %s302_s22 }
  0x87   :  { %65 = vrot.lane.b32.xlu2 %v63_v18, %s303_s23 }
  0x89   :  { %v71_v25 = vpop.permute.xlu0 %70 }
  0x8a   :  { %v73_v26 = vadd.f32 %v71_v25, %v40_v24 }
  0x8e   :  { %93 = vrot.lane.b32.xlu1 %v92_v21, %s303_s23 }
  0x96   :  { %115 = vrot.lane.b32.xlu1 %v110_v22, %s304_s28 }
  0x9e   :  { %212 = vrot.lane.b32.xlu1 %v111_v51, %s306_s6 }
  0xe1   :  { %v66_v34 = vpop.permute.xlu2 %65 }
  0xe2   :  { %v68_v35 = vadd.f32 %v66_v34, %v57_v33 }
  0xf8   :  { %v82_v27 = vpop.permute.xlu1 %81 }
  0xf9   :  { %v84_v28 = vadd.f32 %v82_v27, %v73_v26 }
  0xfb   :  { %v86_v29 = vrot.slane %v84_v28, 1 }
  0xfd   :  { %87 = vrot.lane.b32.xlu0 %v86_v29, %s300_s17 }
 0x100   :  { %v94_v37 = vpop.permute.xlu1 %93 }
 0x105   :  { %168 = vrot.lane.b32.xlu0 %v110_v22, %s305_s29 }
 0x108   :  { %v116_v44 = vpop.permute.xlu1 %115 }
 0x109   :  { %244 = vmatpush.msk.msra.mxu0 %vm120_vm0, %v116_v44 }
 0x110   :  { %v213_v1 = vpop.permute.xlu1 %212 }
 0x16f   :  { %v88_v36 = vpop.permute.xlu0 %87 }
 0x170   :  { %v90_v38 = vadd.f32 %v88_v36, %v68_v35 }
 0x172   :  { %v96_v40 = vadd.f32 %v94_v37, %v90_v38 }
 0x174   :  { %v99_v41 = vadd.f32 %v98_v39, %v96_v40 }
 0x176   :  { %v100_v42 = vmax.f32 %v99_v41, 0.0 }
 0x177   :  { %v169_v43 = vpop.permute.xlu0 %168 }
 0x178   :  { %102 = vrot.lane.b32.xlu2 %v100_v42, %s300_s17  ;;  %248 = vmatpush.msk.msra.mxu2 %vm120_vm0, %v169_v43 }
 0x1d2   :  { %v103_v45 = vpop.permute.xlu2 %102 }
 0x1d3   :  { %v105_v46 = vmax.f32 %v100_v42, %v103_v45 }
 0x1d5   :  { %v107_v47 = vrot.slane %v105_v46, 1 }
 0x1d7   :  { %v109_v48 = vmax.f32 %v105_v46, %v107_v47 }
 0x1d9   :  { %247 = vmatmul.msk.f32.vlgmr.msra.gmra.mxu1 %vm117_vm1, %v109_v48  ;;  %v113_v49 = vrot.slane %v109_v48, 2  ;;  %v167_v50 = vrot.slane %v109_v48, 4 }
 0x1db   :  { %245 = vmatmul.msk.f32.vlgmr.msra.gmra.mxu0 %vm117_vm1, %v113_v49  ;;  %249 = vmatmul.msk.f32.vlgmr.msra.gmra.mxu2 %vm117_vm1, %v167_v50 }
 0x256   :  { %v164_v53 = vpop.f32.mrf.mxu1 }
 0x258   :  { %v140_v52 = vpop.f32.mrf.mxu0 }
 0x259   :  { %v165_v56 = vadd.f32 %v164_v53, %v140_v52 }
 0x25e   :  { %v191_v54 = vpop.f32.mrf.mxu2 }
 0x25f   :  { %v192_v57 = vadd.f32 %v191_v54, %v111_v51 }
 0x261   :  { %v194_v58 = vadd.f32 %v192_v57, %v165_v56 }
 0x263   :  { %v195_v60 = vmax.f32 %v194_v58, 0.0 }
 0x265   :  { %v205_v61 = vmul.f32 %v203_v59, %v195_v60  ;;  %v197_v62 = vmul.f32 %v196_v55, %v195_v60 }
 0x267   :  { %v206_v63 = vsel %vm198_vm2, %v205_v61, 0.0  ;;  %v199_v0 = vsel %vm198_vm2, %v197_v62, 0.0 }
 0x268   :  { %207 = vadd.xlane.f32.xlu0 %v206_v63  ;;  %200 = vadd.xlane.f32.xlu2 %v199_v0 }
 0x2db   :  { %v208_v2 = vpop.xlane.xlu0 %207  ;;  %v201_v3 = vpop.xlane.xlu2 %200 }
 0x2dc   :  { %v210_v4 = vsel %vm209_vm3, %v201_v3, %v208_v2 }
 0x2dd   :  { %v215_v5 = vadd.f32 %v213_v1, %v210_v4 }
 0x2df   :  { %217 = vst.msk [vmem:[#allocation5] sm:$0x1] %vm216_vm4, %v215_v5 }
 0x2e0   :  { %228 = dma.vmem_to_hbm [thread:$0]  %s224_s10, 16, %s226_s1, [#allocation3]  }
 0x2e1   :  { %297 = dma.done.wait [#allocation3], 16  }
 0x2e2   :  { %298 = vsyncadd [#allocation3], 4294967280 }
 0x2e3   :  { %233 = vsyncpa [#allocation3], 1 }
 0x2e4   :  { %234 = vsyncpa [#allocation4], 1 }

</bundles_post_ra>
